<compile_context>
chip_gen: v6e
topology: v6e:2x2x1
jax: 0.10.0
libtpu: 0.0.40
codegen_flags: <defaults>
</compile_context>

<pallas_src>
import functools

import jax
import jax.numpy as jnp
import numpy as np
from jax.experimental import pallas as pl
from jax.experimental.pallas import tpu as pltpu


def _se_kernel(x_ref, w1t_ref, w2t_ref, o_ref, *, inv_hw):
    # x_ref:   (TB, C, HW)  TB batch elements (last grid block may be partial)
    # w1t_ref: (C, r)       fc1 weight, pre-transposed (PyTorch weight is (r, C))
    # w2t_ref: (r, C)       fc2 weight, pre-transposed (PyTorch weight is (C, r))
    # o_ref:   (TB, C, HW)

    # Global average pool: f32 accumulation over the lane axis, no materialized
    # full-block upcast.
    pooled = jnp.sum(x_ref[...], axis=-1, dtype=jnp.float32) * inv_hw     # (TB, C)

    # fc1 + ReLU  (M = TB on the MXU instead of M = 1)
    h = jnp.maximum(
        jnp.dot(pooled, w1t_ref[...].astype(jnp.float32),
                preferred_element_type=jnp.float32),
        0.0)                                                              # (TB, r)

    # fc2 + Hardsigmoid:  clip(y/6 + 0.5, 0, 1)  ==  relu6(y + 3) / 6
    y = jnp.dot(h, w2t_ref[...].astype(jnp.float32),
                preferred_element_type=jnp.float32)                       # (TB, C)
    s = jnp.clip(y * (1.0 / 6.0) + 0.5, 0.0, 1.0)                         # (TB, C)

    # Cast the tiny scale once; big elementwise multiply runs in x.dtype
    # (native bf16 VALU on v6e/v7x, identical math for f32).
    s_b = s.astype(x_ref.dtype)
    o_ref[...] = x_ref[...] * s_b[:, :, None]


def _target_is_v7x() -> bool:
    try:
        kind = jax.devices()[0].device_kind
    except Exception:
        return False
    return "v7" in str(kind).lower()


def se_block(x_nchw, w1, w2, *, block_budget_bytes=16 * 1024 * 1024):
    """Squeeze-and-Excitation forward.

    x_nchw: (N, C, H, W); w1: (r, C); w2: (C, r) -- PyTorch nn.Linear layouts,
    bias=False (as in the MobileNetV3 SeBlock spec).
    """
    N, C, H, W = x_nchw.shape
    r = w1.shape[0]
    HW = H * W
    dtype = x_nchw.dtype
    itemsize = jnp.dtype(dtype).itemsize

    # Flatten spatial dims; last block dim = full HW extent (no padding needed).
    x_flat = x_nchw.reshape(N, C, HW)

    # --- pick batch tile TB -------------------------------------------------
    # 4 resident buffers (in + out, double-buffered) of TB*C*HW*itemsize each
    # must fit the (conservative, cross-generation) block budget.
    bytes_per_batch_elem = C * HW * itemsize
    tb_cap = max(1, block_budget_bytes // (4 * bytes_per_batch_elem))
    if _target_is_v7x() and N >= 2:
        # Keep >= 2 grid blocks only where it buys parallelism (v7x has 2 TCs).
        tb_cap = min(tb_cap, -(-N // 2))
    TB = int(min(tb_cap, N))
    grid = (pl.cdiv(N, TB),)   # partial last block is safe: batch-row-local math,
                               # out-of-range rows are masked on store.

    w1t = w1.T   # (C, r)
    w2t = w2.T   # (r, C)

    kernel = functools.partial(_se_kernel, inv_hw=1.0 / float(HW))

    cost = pl.CostEstimate(
        flops=2 * N * C * (HW + 2 * r),
        transcendentals=0,
        bytes_accessed=2 * N * C * HW * itemsize
        + 2 * C * r * jnp.dtype(w1.dtype).itemsize,
    )

    out_flat = pl.pallas_call(
        kernel,
        out_shape=jax.ShapeDtypeStruct((N, C, HW), dtype),
        grid_spec=pltpu.PrefetchScalarGridSpec(
            num_scalar_prefetch=0,
            grid=grid,
            in_specs=[
                pl.BlockSpec((TB, C, HW), lambda i: (i, 0, 0)),
                pl.BlockSpec((C, r), lambda i: (0, 0)),
                pl.BlockSpec((r, C), lambda i: (0, 0)),
            ],
            out_specs=pl.BlockSpec((TB, C, HW), lambda i: (i, 0, 0)),
        ),
        compiler_params=pltpu.CompilerParams(
            dimension_semantics=("parallel",),
            # 32 MiB scoped VMEM: above the v5e default, at the v6e/v7x default,
            # and within every generation's physical VMEM.
            vmem_limit_bytes=32 * 1024 * 1024,
        ),
        cost_estimate=cost,
    )(x_flat, w1t, w2t)

    return out_flat.reshape(N, C, H, W)


def se_block_ref(x, w1, w2):
    """Pure-JAX reference mirroring the PyTorch forward exactly."""
    f = jnp.mean(x.astype(jnp.float32), axis=(2, 3))        # AdaptiveAvgPool2d + flatten
    f = jnp.maximum(f @ w1.T.astype(jnp.float32), 0.0)      # relu(fc1(f))
    f = jnp.clip(f @ w2.T.astype(jnp.float32) / 6.0 + 0.5, 0.0, 1.0)  # hardsigmoid(fc2(f))
    return (x.astype(jnp.float32) * f[:, :, None, None]).astype(x.dtype)


if __name__ == "__main__":
    key = jax.random.PRNGKey(0)

    # Case 1: small, 128-aligned spatial (C=8 -> r=2); single big block.
    N, C, H, W = 2, 8, 16, 16
    r = C // 4
    kx, k1, k2, key = jax.random.split(key, 4)
    x = jax.random.normal(kx, (N, C, H, W), dtype=jnp.float32)
    w1 = jax.random.normal(k1, (r, C), dtype=jnp.float32) * 0.5   # fc1: C -> r
    w2 = jax.random.normal(k2, (C, r), dtype=jnp.float32) * 0.5   # fc2: r -> C

    out = jax.block_until_ready(se_block(x, w1, w2))
    ref = se_block_ref(x, w1, w2)
    assert out.shape == (N, C, H, W)
    assert np.all(np.isfinite(np.asarray(out)))
    assert np.allclose(np.asarray(out), np.asarray(ref), atol=1e-5, rtol=1e-5)

    # Case 2: non-128-multiple HW (MobileNetV3-like 7x7); exercises the
    # unpadded full-extent last block dim.
    N2, C2, H2, W2 = 4, 16, 7, 7
    r2 = C2 // 4
    kx2, k12, k22, key = jax.random.split(key, 4)
    x2 = jax.random.normal(kx2, (N2, C2, H2, W2), dtype=jnp.float32)
    w1b = jax.random.normal(k12, (r2, C2), dtype=jnp.float32) * 0.5
    w2b = jax.random.normal(k22, (C2, r2), dtype=jnp.float32) * 0.5

    out2 = jax.block_until_ready(se_block(x2, w1b, w2b))
    ref2 = se_block_ref(x2, w1b, w2b)
    assert out2.shape == (N2, C2, H2, W2)
    assert np.all(np.isfinite(np.asarray(out2)))
    assert np.allclose(np.asarray(out2), np.asarray(ref2), atol=1e-5, rtol=1e-5)

    # Case 3: odd batch with a forced small block budget -> TB=2, cdiv grid
    # with a partial last block (checks masked stores / no NaN leakage).
    N3, C3, H3, W3 = 5, 8, 8, 8
    r3 = C3 // 4
    kx3, k13, k23, key = jax.random.split(key, 4)
    x3 = jax.random.normal(kx3, (N3, C3, H3, W3), dtype=jnp.float32)
    w1c = jax.random.normal(k13, (r3, C3), dtype=jnp.float32) * 0.5
    w2c = jax.random.normal(k23, (C3, r3), dtype=jnp.float32) * 0.5

    out3 = jax.block_until_ready(
        se_block(x3, w1c, w2c, block_budget_bytes=16 * 1024))
    ref3 = se_block_ref(x3, w1c, w2c)
    assert out3.shape == (N3, C3, H3, W3)
    assert np.all(np.isfinite(np.asarray(out3)))
    assert np.allclose(np.asarray(out3), np.asarray(ref3), atol=1e-5, rtol=1e-5)

    print("KERNEL_OK")
</pallas_src>

<mosaic_0001>
module attributes {stable_mosaic.version = 11 : i64} {
  func.func @_se_kernel(%arg0: i32, %arg1: memref<2x8x256xf32, #tpu.memory_space<vmem>>, %arg2: memref<8x2xf32, #tpu.memory_space<vmem>>, %arg3: memref<2x8xf32, #tpu.memory_space<vmem>>, %arg4: memref<2x8x256xf32, #tpu.memory_space<vmem>>) attributes {dimension_semantics = [#tpu.dimension_semantics<parallel>], iteration_bounds = array<i64: 1>, scalar_prefetch = 0 : i64, scratch_operands = 0 : i64, tpu.core_type = #tpu.core_type<tc>, window_params = [{transform_indices = @transform_0, window_bounds = array<i64: 2, 8, 256>}, {pipeline_mode = #tpu.pipeline_mode<synchronous>, transform_indices = @transform_1, window_bounds = array<i64: 8, 2>}, {pipeline_mode = #tpu.pipeline_mode<synchronous>, transform_indices = @transform_2, window_bounds = array<i64: 2, 8>}, {transform_indices = @transform_3, window_bounds = array<i64: 2, 8, 256>}]} {
    %c0 = arith.constant 0 : index
    %c0_0 = arith.constant 0 : index
    %c0_1 = arith.constant 0 : index
    %0 = vector.load %arg1[%c0, %c0_0, %c0_1] : memref<2x8x256xf32, #tpu.memory_space<vmem>>, vector<2x8x256xf32>
    %cst = arith.constant dense<0.000000e+00> : vector<2x8xf32>
    %1 = vector.multi_reduction <add>, %0, %cst [2] : vector<2x8x256xf32> to vector<2x8xf32>
    %cst_2 = arith.constant 3.906250e-03 : f32
    %2 = vector.broadcast %cst_2 : f32 to vector<2x8xf32>
    %3 = arith.mulf %1, %2 : vector<2x8xf32>
    %c0_3 = arith.constant 0 : index
    %c0_4 = arith.constant 0 : index
    %4 = vector.load %arg2[%c0_3, %c0_4] : memref<8x2xf32, #tpu.memory_space<vmem>>, vector<8x2xf32>
    %cst_5 = arith.constant dense<0.000000e+00> : vector<2x2xf32>
    %5 = tpu.matmul %3, %4, %cst_5 {dimension_numbers = #tpu.dot_dimension_numbers<[1], [0], [0], [1], [0, 0, 1, 1], [], []>} : vector<2x8xf32>, vector<8x2xf32>, vector<2x2xf32> -> vector<2x2xf32>
    %cst_6 = arith.constant 0.000000e+00 : f32
    %6 = vector.broadcast %cst_6 : f32 to vector<2x2xf32>
    %7 = arith.maximumf %5, %6 : vector<2x2xf32>
    %c0_7 = arith.constant 0 : index
    %c0_8 = arith.constant 0 : index
    %8 = vector.load %arg3[%c0_7, %c0_8] : memref<2x8xf32, #tpu.memory_space<vmem>>, vector<2x8xf32>
    %cst_9 = arith.constant dense<0.000000e+00> : vector<2x8xf32>
    %9 = tpu.matmul %7, %8, %cst_9 {dimension_numbers = #tpu.dot_dimension_numbers<[1], [0], [0], [1], [0, 0, 1, 1], [], []>} : vector<2x2xf32>, vector<2x8xf32>, vector<2x8xf32> -> vector<2x8xf32>
    %cst_10 = arith.constant 0.166666672 : f32
    %10 = vector.broadcast %cst_10 : f32 to vector<2x8xf32>
    %11 = arith.mulf %9, %10 : vector<2x8xf32>
    %cst_11 = arith.constant 5.000000e-01 : f32
    %12 = vector.broadcast %cst_11 : f32 to vector<2x8xf32>
    %13 = arith.addf %11, %12 : vector<2x8xf32>
    %cst_12 = arith.constant 0.000000e+00 : f32
    %cst_13 = arith.constant 1.000000e+00 : f32
    %14 = vector.broadcast %cst_12 : f32 to vector<2x8xf32>
    %15 = arith.maximumf %14, %13 : vector<2x8xf32>
    %16 = vector.broadcast %cst_13 : f32 to vector<2x8xf32>
    %17 = arith.minimumf %16, %15 : vector<2x8xf32>
    %c0_14 = arith.constant 0 : index
    %c0_15 = arith.constant 0 : index
    %c0_16 = arith.constant 0 : index
    %18 = vector.load %arg1[%c0_14, %c0_15, %c0_16] : memref<2x8x256xf32, #tpu.memory_space<vmem>>, vector<2x8x256xf32>
    %19 = vector.shape_cast %17 : vector<2x8xf32> to vector<2x8x1xf32>
    %20 = vector.broadcast %19 : vector<2x8x1xf32> to vector<2x8x256xf32>
    %21 = arith.mulf %18, %20 : vector<2x8x256xf32>
    %c0_17 = arith.constant 0 : index
    %c0_18 = arith.constant 0 : index
    %c0_19 = arith.constant 0 : index
    %22 = vector.load %arg4[%c0_17, %c0_18, %c0_19] : memref<2x8x256xf32, #tpu.memory_space<vmem>>, vector<2x8x256xf32>
    tpu.vector_store %arg4[%c0_17, %c0_18, %c0_19], %21 {strides = array<i32>} : memref<2x8x256xf32, #tpu.memory_space<vmem>>, vector<2x8x256xf32>,
    return
  }
  func.func @transform_0(%arg0: i32) -> (i32, i32, i32) {
    %c0_i32 = arith.constant 0 : i32
    %c0_i32_0 = arith.constant 0 : i32
    %c0_i32_1 = arith.constant 0 : i32
    return %arg0, %c0_i32, %c0_i32_0 : i32, i32, i32
  }
  func.func @transform_1(%arg0: i32) -> (i32, i32) {
    %c0_i32 = arith.constant 0 : i32
    %c0_i32_0 = arith.constant 0 : i32
    %c0_i32_1 = arith.constant 0 : i32
    return %c0_i32, %c0_i32_0 : i32, i32
  }
  func.func @transform_2(%arg0: i32) -> (i32, i32) {
    %c0_i32 = arith.constant 0 : i32
    %c0_i32_0 = arith.constant 0 : i32
    %c0_i32_1 = arith.constant 0 : i32
    return %c0_i32, %c0_i32_0 : i32, i32
  }
  func.func @transform_3(%arg0: i32) -> (i32, i32, i32) {
    %c0_i32 = arith.constant 0 : i32
    %c0_i32_0 = arith.constant 0 : i32
    %c0_i32_1 = arith.constant 0 : i32
    return %arg0, %c0_i32, %c0_i32_0 : i32, i32, i32
  }
}

</mosaic_0001>

<bundles_post_ra>
// kernel: tpu_custom_call.1
= control target key start
LH: loop header
LB: loop body
LE: loop exit
PB: predicated region body
PF: predicated region fallthrough
CT: control target
= control target key end

     0   :  { %8 = vsyncpa [#allocation3], 0  ;;  %s363_s0 = inlined_call_operand.hbm [shape: f32[2,8,256], index: 0, kind: input, shape index: {}]   ;;  %s364_s1 = inlined_call_operand.vmem [shape: f32[8,2], index: 1, kind: input, shape index: {}]   ;;  %s365_s2 = inlined_call_operand.vmem [shape: f32[2,8], index: 2, kind: input, shape index: {}]   ;;  %s366_s3 = inlined_call_operand.hbm [shape: f32[2,8,256], index: 3, kind: output, shape index: {}]  }
   0x1   :  { %9 = vsyncpa [#allocation4], 0  ;;  %s319_s12 = smov [#allocation2]  }
   0x2   :  { %s15_s13 = sshll.u32 %s319_s12, 4  ;;  %s16_s13 = int_to_ptr.vmem [resolvable:$true] %s15_s13 }
   0x3   :  { %s283_s14 = scalar_lea.vmem %s16_s13, 512  ;;  %p288_p1 = scmp.lt.s32.totalorder %s16_s13, %s16_s13 }
   0x4   :  { %p284_p0 = scmp.ne.s32.totalorder %s16_s13, %s283_s14  ;;  %p289_p2 = scmp.lt.s32.totalorder %s283_s14, %s283_s14 }
   0x6   :  { %p290_p3 = por %p289_p2, %p288_p1 }
   0x8   :  { %p291_p4 = pnand %p290_p3, %p284_p0 }
   0xa   :  { %294 = shalt.err (!%p291_p4)
}
   0xb   :  { %s320_s15 = smov 256   ;;  %s321_s16 = smov 16  }
   0xc   :  { %21 = dma.hbm_to_vmem [thread:$0]  %s363_s0, 512, %s16_s13, [#allocation3], %s320_s15, %s320_s15, %s321_s16  }
   0xd   :  { %315 = dma.done.wait [#allocation3], 512  }
   0xe   :  { %316 = vsyncadd [#allocation3], 4294966784  ;;  %v29_v0 = vld [vmem:[#allocation2] sm:$0xff]  ;;  %v30_v1 = vld [vmem:[#allocation2 + $0x8] sm:$0xff]  ;;  %v322_v7 = vmov 0.0   ;;  %vm323_vm0 = vmmov 0   ;;  %v44_v8 = vlaneseq }
   0xf   :  { %v31_v2 = vld [vmem:[#allocation2 + $0x10] sm:$0xff]  ;;  %v33_v3 = vadd.f32 %v30_v1, %v29_v0  ;;  %v32_v4 = vld [vmem:[#allocation2 + $0x18] sm:$0xff]  ;;  %v41_v6 = vld [vmem:[%s364_s1] sm:$0xff]  ;;  %259 = vmatprep.subr.mxu0 %v322_v7  ;;  %261 = vmatprep.mubr.msk.f32.mxu0 %vm323_vm0, %v322_v7  ;;  %vm54_vm1 = vcmask 1041409   ;;  %vm56_vm2 = vcmask 64512   ;;  %vm135_vm3 = vcmask 1041408  }
  0x10   :  { %v36_v5 = vadd.f32 %v32_v4, %v31_v2  ;;  %260 = vmatpush3.msra.mxu0 %v41_v6  ;;  %264 = vmatprep.subr.mxu1 %v322_v7  ;;  %v45_v9 = vand.u32 127, %v44_v8  ;;  %v47_v10 = vshrl.u32 %v44_v8, 7  ;;  %v130_v19 = vld [vmem:[%s365_s2] sm:$0x3]  ;;  %vm131_vm4 = vcmask 15360   ;;  %s324_s2 = smov [#allocation5]  }
  0x11   :  { %34 = vadd.xlane.f32.xlu0 %v33_v3  ;;  %266 = vmatprep.mubr.msk.f32.mxu1 %vm323_vm0, %v322_v7  ;;  %s240_s21 = sshll.u32 %s324_s2, 4  ;;  %s241_s21 = int_to_ptr.vmem [resolvable:$true] %s240_s21 }
  0x12   :  { %v48_v12 = vsub.s32 %v45_v9, %v47_v10  ;;  %265 = vmatpush3.msk.msra.mxu1 %vm135_vm3, %v130_v19  ;;  %v215_v28 = vsub.s32 0, %v47_v10  ;;  %v222_v31 = vsub.s32 1, %v47_v10  ;;  %s295_s22 = scalar_lea.vmem %s241_s21, 512  ;;  %p300_p6 = scmp.lt.s32.totalorder %s241_s21, %s241_s21 }
  0x13   :  { %p296_p5 = scmp.ne.s32.totalorder %s241_s21, %s295_s22  ;;  %p301_p7 = scmp.lt.s32.totalorder %s295_s22, %s295_s22 }
  0x15   :  { %37 = vadd.xlane.f32.xlu0 %v36_v5  ;;  %p302_p8 = por %p301_p7, %p300_p6 }
  0x17   :  { %p303_p9 = pnand %p302_p8, %p296_p5 }
  0x9a   :  { %v35_v11 = vpop.xlane.xlu0 %34 }
  0x9b   :  { %v39_v13 = vmul.f32 0.00390625, %v35_v11 }
  0x9d   :  { %v49_v16 = vrot.slane %v39_v13, %v48_v12 }
  0x9e   :  { %v38_v14 = vpop.xlane.xlu0 %37 }
  0x9f   :  { %v40_v15 = vmul.f32 0.00390625, %v38_v14 }
  0xa1   :  { %v53_v17 = vrot.slane %v40_v15, %v48_v12 }
  0xa3   :  { %v55_v18 = vsel %vm54_vm1, %v53_v17, %v49_v16 }
  0xa4   :  { %262 = vmatmul.mubr.msk.f32.vlgmr.msra.gmra.mxu0 %vm56_vm2, %v55_v18 }
 0x164   :  { %v125_v20 = vpop.f32.mrf.mxu0 }
 0x165   :  { %v129_v21 = vmax.f32 %v125_v20, 0.0 }
 0x166   :  { %v263_v22 = vpop.f32.mrf.mxu0 }
 0x167   :  { %267 = vmatmul.mubr.msk.f32.vlgmr.msra.gmra.mxu1 %vm131_vm4, %v129_v21 }
 0x227   :  { %v205_v23 = vpop.f32.mrf.mxu1 }
 0x228   :  { %v209_v24 = vmul.f32 0.16666667, %v205_v23 }
 0x229   :  { %v268_v25 = vpop.f32.mrf.mxu1 }
 0x22a   :  { %v210_v26 = vadd.f32 0.5, %v209_v24 }
 0x22c   :  { %v211_v27 = vmax.f32 %v210_v26, 0.0 }
 0x22e   :  { %v212_v29 = vmin.f32 %v211_v27, 1.0 }
 0x230   :  { %v216_v30 = vrot.slane %v212_v29, %v215_v28  ;;  %v223_v32 = vrot.slane %v212_v29, %v222_v31 }
 0x232   :  { %218 = vbcast.lane.b32.xlu1 %v216_v30, 256 }
 0x236   :  { %225 = vbcast.lane.b32.xlu1 %v223_v32, 256 }
 0x2a4   :  { %v219_v33 = vpop.permute.xlu1 %218 }
 0x2a5   :  { %v227_v34 = vmul.f32 %v219_v33, %v29_v0  ;;  %v228_v35 = vmul.f32 %v219_v33, %v30_v1 }
 0x2a7   :  { %231 = vst [vmem:[#allocation5] sm:$0xff] %v227_v34  ;;  %232 = vst [vmem:[#allocation5 + $0x8] sm:$0xff] %v228_v35 }
 0x2a8   :  { %v226_v36 = vpop.permute.xlu1 %225 }
 0x2a9   :  { %v229_v37 = vmul.f32 %v226_v36, %v31_v2  ;;  %v230_v38 = vmul.f32 %v226_v36, %v32_v4 }
 0x2ab   :  { %233 = vst [vmem:[#allocation5 + $0x10] sm:$0xff] %v229_v37  ;;  %234 = vst [vmem:[#allocation5 + $0x18] sm:$0xff] %v230_v38 }
 0x2ac   :  { %306 = shalt.err (!%p303_p9)
}
 0x2ad   :  { %246 = dma.vmem_to_hbm [thread:$0]  %s241_s21, 512, %s366_s3, [#allocation4], %s320_s15, %s320_s15, %s321_s16  }
 0x2ae   :  { %317 = dma.done.wait [#allocation4], 512  }
 0x2af   :  { %318 = vsyncadd [#allocation4], 4294966784 }
 0x2b0   :  { %250 = vsyncpa [#allocation3], 1 }
 0x2b1   :  { %251 = vsyncpa [#allocation4], 1 }

</bundles_post_ra>
